<compile_context>
chip_gen: v7x
topology: tpu7x:2x2x1
jax: 0.10.0
libtpu: 0.0.40
codegen_flags: <defaults>
</compile_context>

<pallas_src>
import functools
import math

import jax
import jax.numpy as jnp
from jax import lax
from jax.experimental import pallas as pl
from jax.experimental.pallas import tpu as pltpu


# ----------------------------------------------------------------------------
# Fused encoder kernel
# ----------------------------------------------------------------------------
def _encoder_kernel(xc_ref, yc_ref, xt_ref, w_ref, b_ref, mask_ref, o_ref, *,
                    w_layout, b_layout, num_hidden_layers, num_heads):
    f32 = jnp.float32

    def w(name):
        off, r, c = w_layout[name]
        return w_ref[off:off + r, :c]        # static Ref-view slice (free)

    def b(name):
        row, c = b_layout[name]
        return b_ref[row:row + 1, :c]

    xc = xc_ref[...]                          # (B*Nc, Din)
    yc = yc_ref[...]                          # (B*Nc, Dy)
    xt = xt_ref[...]                          # (B*Nt, Din)

    # ---- MLP on context (torch.cat fused into split first-layer weights) ---
    h = (jnp.dot(xc, w("w0x"), preferred_element_type=f32)
         + jnp.dot(yc, w("w0y"), preferred_element_type=f32)
         + b("b0"))
    h = jnp.maximum(h, 0.0)
    for i in range(num_hidden_layers):
        h = jnp.dot(h, w(f"wh{i}"), preferred_element_type=f32) + b(f"bh{i}")
        h = jnp.maximum(h, 0.0)
    # Last MLP layer (h @ Wl + bl) is folded into the value projection below.

    # ---- Folded Q / K / V projections (x_encoder + in_proj + scale) --------
    q = jnp.dot(xt, w("wq"), preferred_element_type=f32) + b("bq")  # scaled
    k = jnp.dot(xc, w("wk"), preferred_element_type=f32) + b("bk")
    v = jnp.dot(h, w("wv"), preferred_element_type=f32) + b("bv")

    bnt, latent = q.shape
    head_dim = latent // num_heads
    mask = mask_ref[...]                      # additive {0, -1e30}, (B*Nt, B*Nc)

    lane = lax.broadcasted_iota(jnp.int32, (1, latent), 1)
    ctx = jnp.zeros((bnt, latent), f32)
    # Lane-mask head trick (valid while head_dim < 128): only head-h lanes of
    # q_h / v_h are non-zero, so full-width matmuls equal per-head matmuls and
    # the accumulation equals the head concat — no XLU shuffles, no slices.
    for hh in range(num_heads):
        head_mask = (lane >= hh * head_dim) & (lane < (hh + 1) * head_dim)
        q_h = jnp.where(head_mask, q, 0.0)
        s = lax.dot_general(q_h, k, (((1,), (1,)), ((), ())),
                            preferred_element_type=f32) + mask
        s = s - jnp.max(s, axis=-1, keepdims=True)
        p = jnp.exp(s)
        denom = jnp.sum(p, axis=-1, keepdims=True)
        p = p * pl.reciprocal(denom, approx=False)
        v_h = jnp.where(head_mask, v, 0.0)
        ctx = ctx + jnp.dot(p, v_h, preferred_element_type=f32)

    out = jnp.dot(ctx, w("wo"), preferred_element_type=f32) + b("bo")
    o_ref[...] = out.astype(o_ref.dtype)


def _full_spec(arr):
    nd = arr.ndim
    return pl.BlockSpec(arr.shape, lambda: (0,) * nd)


# ----------------------------------------------------------------------------
# Host-side folding + packing of all parameters into two slabs
# ----------------------------------------------------------------------------
def fold_and_pack(params, num_heads):
    net = params["net"]
    w0x, w0y, b0 = net[0]
    hidden_layers = net[1:-1]
    wl, bl = net[-1]
    latent = params["wo"].shape[1]
    head_dim = latent // num_heads
    scale = 1.0 / math.sqrt(head_dim)

    # Fold x_encoder into Q/K, last MLP layer into V, softmax scale into Q.
    wq_eff = (params["xe_w"] @ params["wq"]) * scale
    bq_eff = (params["xe_b"] @ params["wq"] + params["bq"]) * scale
    wk_eff = params["xe_w"] @ params["wk"]
    bk_eff = params["xe_b"] @ params["wk"] + params["bk"]
    wv_eff = wl @ params["wv"]
    bv_eff = bl @ params["wv"] + params["bv"]

    weights = [("w0x", w0x), ("w0y", w0y)]
    biases = [("b0", b0)]
    for i, (w, b) in enumerate(hidden_layers):
        weights.append((f"wh{i}", w))
        biases.append((f"bh{i}", b))
    weights += [("wq", wq_eff), ("wk", wk_eff), ("wv", wv_eff),
                ("wo", params["wo"])]
    biases += [("bq", bq_eff), ("bk", bk_eff), ("bv", bv_eff),
               ("bo", params["bo"])]

    wmax = max(w.shape[1] for _, w in weights)

    # Weight slab: each matrix row-padded to a multiple of 8 sublanes,
    # column-padded to the common width, stacked along axis 0.
    w_layout, rows, off = {}, [], 0
    for name, w in weights:
        r, c = w.shape
        pr = -(-r // 8) * 8
        wp = jnp.zeros((pr, wmax), jnp.float32).at[:r, :c].set(w)
        w_layout[name] = (off, r, c)
        rows.append(wp)
        off += pr
    w_slab = jnp.concatenate(rows, axis=0)

    # Bias slab: one row per bias vector.
    b_layout, brows = {}, []
    for i, (name, b) in enumerate(biases):
        c = b.shape[-1]
        bp = jnp.zeros((1, wmax), jnp.float32).at[:, :c].set(b.reshape(1, c))
        b_layout[name] = (i, c)
        brows.append(bp)
    b_slab = jnp.concatenate(brows, axis=0)
    pad = -(-b_slab.shape[0] // 8) * 8 - b_slab.shape[0]
    if pad:
        b_slab = jnp.pad(b_slab, ((0, pad), (0, 0)))

    packed = dict(w_slab=w_slab, b_slab=b_slab, w_layout=w_layout,
                  b_layout=b_layout, num_hidden_layers=len(hidden_layers),
                  latent=latent, hidden=w0x.shape[1])
    return packed


# ----------------------------------------------------------------------------
# Forward wrapper
# ----------------------------------------------------------------------------
def encoder_forward(packed, x_context, y_context, x_target, num_heads=4):
    """x_context: (B, Nc, Din); y_context: (B, Nc, Dy); x_target: (B, Nt, Din)
    -> (B, Nt, latent_dim).  context_mask=None path of the reference module."""
    B, Nc, Din = x_context.shape
    Dy = y_context.shape[-1]
    Nt = x_target.shape[1]
    latent = packed["latent"]
    H = packed["hidden"]
    nh = packed["num_hidden_layers"]

    xc = x_context.reshape(B * Nc, Din)
    yc = y_context.reshape(B * Nc, Dy)
    xt = x_target.reshape(B * Nt, Din)

    # Precomputed block-diagonal additive mask (batch folded into rows):
    # query row of batch b attends only keys of batch b.
    row_b = jnp.arange(B * Nt, dtype=jnp.int32) // Nt
    col_b = jnp.arange(B * Nc, dtype=jnp.int32) // Nc
    mask = jnp.where(row_b[:, None] == col_b[None, :], 0.0, -1e30)
    mask = mask.astype(jnp.float32)

    inputs = [xc, yc, xt, packed["w_slab"], packed["b_slab"], mask]

    kernel = functools.partial(
        _encoder_kernel,
        w_layout=packed["w_layout"],
        b_layout=packed["b_layout"],
        num_hidden_layers=nh,
        num_heads=num_heads,
    )

    flops = 2 * ((B * Nc) * (Din + Dy) * H
                 + nh * (B * Nc) * H * H
                 + (B * Nt) * Din * latent
                 + (B * Nc) * Din * latent
                 + (B * Nc) * H * latent
                 + num_heads * 2 * (B * Nt) * (B * Nc) * latent
                 + (B * Nt) * latent * latent)
    transcendentals = num_heads * (B * Nt) * (B * Nc)
    bytes_accessed = (sum(a.size * a.dtype.itemsize for a in inputs)
                      + (B * Nt) * latent * 4)

    out = pl.pallas_call(
        kernel,
        out_shape=jax.ShapeDtypeStruct((B * Nt, latent), x_target.dtype),
        in_specs=[_full_spec(a) for a in inputs],
        out_specs=pl.BlockSpec((B * Nt, latent), lambda: (0, 0)),
        compiler_params=pltpu.CompilerParams(
            vmem_limit_bytes=32 * 1024 * 1024),
        cost_estimate=pl.CostEstimate(flops=int(flops),
                                      transcendentals=int(transcendentals),
                                      bytes_accessed=int(bytes_accessed)),
    )(*inputs)
    return out.reshape(B, Nt, latent)


# ----------------------------------------------------------------------------
# Parameter construction (deterministic, synthetic — no checkpoint loading)
# ----------------------------------------------------------------------------
def init_params(key, input_dim, output_dim, hidden_dim, latent_dim,
                hidden_layers_enc):
    def dense(k, din, dout, scale=0.1):
        kw, kb = jax.random.split(k)
        w = jax.random.normal(kw, (din, dout), jnp.float32) * scale
        b = jax.random.normal(kb, (1, dout), jnp.float32) * scale
        return w, b

    keys = jax.random.split(key, hidden_layers_enc + 8)
    params = {}

    # First Linear(input+output -> hidden) with the concat fused: split W into
    # W_x (input_dim rows) and W_y (output_dim rows).
    w0, b0 = dense(keys[0], input_dim + output_dim, hidden_dim)
    net = [(w0[:input_dim], w0[input_dim:], b0)]
    for i in range(hidden_layers_enc):
        net.append(dense(keys[1 + i], hidden_dim, hidden_dim))
    net.append(dense(keys[1 + hidden_layers_enc], hidden_dim, latent_dim))
    params["net"] = net

    k0 = 2 + hidden_layers_enc
    params["xe_w"], params["xe_b"] = dense(keys[k0], input_dim, latent_dim)
    params["wq"], params["bq"] = dense(keys[k0 + 1], latent_dim, latent_dim)
    params["wk"], params["bk"] = dense(keys[k0 + 2], latent_dim, latent_dim)
    params["wv"], params["bv"] = dense(keys[k0 + 3], latent_dim, latent_dim)
    params["wo"], params["bo"] = dense(keys[k0 + 4], latent_dim, latent_dim)
    return params


# ----------------------------------------------------------------------------
# Pure-JAX reference (unfolded weights) for correctness check
# ----------------------------------------------------------------------------
def encoder_reference(params, x_context, y_context, x_target, num_heads=4):
    hp = jax.lax.Precision.HIGHEST
    w0x, w0y, b0 = params["net"][0]
    x = jnp.concatenate([x_context, y_context], axis=-1)
    w0 = jnp.concatenate([w0x, w0y], axis=0)
    h = jnp.maximum(jnp.einsum("bnd,dh->bnh", x, w0, precision=hp) + b0, 0.0)
    for w, b in params["net"][1:-1]:
        h = jnp.maximum(jnp.einsum("bnd,dh->bnh", h, w, precision=hp) + b, 0.0)
    wl, bl = params["net"][-1]
    r = jnp.einsum("bnd,dh->bnh", h, wl, precision=hp) + bl
    q_in = jnp.einsum("bnd,dh->bnh", x_target, params["xe_w"], precision=hp) + params["xe_b"]
    k_in = jnp.einsum("bnd,dh->bnh", x_context, params["xe_w"], precision=hp) + params["xe_b"]
    q = jnp.einsum("bnd,dh->bnh", q_in, params["wq"], precision=hp) + params["bq"]
    k = jnp.einsum("bnd,dh->bnh", k_in, params["wk"], precision=hp) + params["bk"]
    v = jnp.einsum("bnd,dh->bnh", r, params["wv"], precision=hp) + params["bv"]
    B, Nt, L = q.shape
    Nc = k.shape[1]
    hd = L // num_heads
    qh = q.reshape(B, Nt, num_heads, hd).transpose(0, 2, 1, 3)
    kh = k.reshape(B, Nc, num_heads, hd).transpose(0, 2, 1, 3)
    vh = v.reshape(B, Nc, num_heads, hd).transpose(0, 2, 1, 3)
    s = jnp.einsum("bhqd,bhkd->bhqk", qh, kh, precision=hp) / math.sqrt(hd)
    p = jax.nn.softmax(s, axis=-1)
    ctx = jnp.einsum("bhqk,bhkd->bhqd", p, vh, precision=hp)
    ctx = ctx.transpose(0, 2, 1, 3).reshape(B, Nt, L)
    return jnp.einsum("bnd,dh->bnh", ctx, params["wo"], precision=hp) + params["bo"]


# ----------------------------------------------------------------------------
if __name__ == "__main__":
    B = 2               # batch_size
    Nc = 8              # n_context_points
    Nt = 10             # n_target_points
    input_dim = 4
    output_dim = 2
    hidden_dim = 32
    latent_dim = 32     # divisible by num_heads=4
    hidden_layers_enc = 2
    num_heads = 4

    key = jax.random.PRNGKey(0)
    k_xc, k_yc, k_xt, k_p = jax.random.split(key, 4)
    x_context = jax.random.normal(k_xc, (B, Nc, input_dim), jnp.float32)
    y_context = jax.random.normal(k_yc, (B, Nc, output_dim), jnp.float32)
    x_target = jax.random.normal(k_xt, (B, Nt, input_dim), jnp.float32)

    params = init_params(k_p, input_dim, output_dim, hidden_dim, latent_dim,
                         hidden_layers_enc)
    packed = fold_and_pack(params, num_heads)

    out = encoder_forward(packed, x_context, y_context, x_target, num_heads)
    jax.block_until_ready(out)
    assert out.shape == (B, Nt, latent_dim), out.shape

    ref = encoder_reference(params, x_context, y_context, x_target, num_heads)
    max_err = float(jnp.max(jnp.abs(out - ref)))
    assert jnp.allclose(out, ref, atol=1e-4, rtol=1e-4), max_err

    print("KERNEL_OK")
</pallas_src>

<mosaic_0001>
module attributes {stable_mosaic.version = 11 : i64} {
  func.func @_encoder_kernel(%arg0: memref<16x4xf32, #tpu.memory_space<vmem>>, %arg1: memref<16x2xf32, #tpu.memory_space<vmem>>, %arg2: memref<20x4xf32, #tpu.memory_space<vmem>>, %arg3: memref<160x32xf32, #tpu.memory_space<vmem>>, %arg4: memref<8x32xf32, #tpu.memory_space<vmem>>, %arg5: memref<20x16xf32, #tpu.memory_space<vmem>>, %arg6: memref<20x32xf32, #tpu.memory_space<vmem>>) attributes {dimension_semantics = [], scalar_prefetch = 0 : i64, scratch_operands = 0 : i64, tpu.core_type = #tpu.core_type<tc>} {
    %c0 = arith.constant 0 : index
    %c0_0 = arith.constant 0 : index
    %0 = vector.load %arg0[%c0, %c0_0] : memref<16x4xf32, #tpu.memory_space<vmem>>, vector<16x4xf32>
    %c0_1 = arith.constant 0 : index
    %c0_2 = arith.constant 0 : index
    %1 = vector.load %arg1[%c0_1, %c0_2] : memref<16x2xf32, #tpu.memory_space<vmem>>, vector<16x2xf32>
    %c0_3 = arith.constant 0 : index
    %c0_4 = arith.constant 0 : index
    %2 = vector.load %arg2[%c0_3, %c0_4] : memref<20x4xf32, #tpu.memory_space<vmem>>, vector<20x4xf32>
    %c0_5 = arith.constant 0 : index
    %c0_6 = arith.constant 0 : index
    %3 = vector.load %arg3[%c0_5, %c0_6] : memref<160x32xf32, #tpu.memory_space<vmem>>, vector<4x32xf32>
    %cst = arith.constant dense<0.000000e+00> : vector<16x32xf32>
    %4 = tpu.matmul %0, %3, %cst {dimension_numbers = #tpu.dot_dimension_numbers<[1], [0], [0], [1], [0, 0, 1, 1], [], []>} : vector<16x4xf32>, vector<4x32xf32>, vector<16x32xf32> -> vector<16x32xf32>
    %c8 = arith.constant 8 : index
    %c0_7 = arith.constant 0 : index
    %5 = vector.load %arg3[%c8, %c0_7] : memref<160x32xf32, #tpu.memory_space<vmem>>, vector<2x32xf32>
    %cst_8 = arith.constant dense<0.000000e+00> : vector<16x32xf32>
    %6 = tpu.matmul %1, %5, %cst_8 {dimension_numbers = #tpu.dot_dimension_numbers<[1], [0], [0], [1], [0, 0, 1, 1], [], []>} : vector<16x2xf32>, vector<2x32xf32>, vector<16x32xf32> -> vector<16x32xf32>
    %7 = arith.addf %4, %6 : vector<16x32xf32>
    %c0_9 = arith.constant 0 : index
    %c0_10 = arith.constant 0 : index
    %8 = vector.load %arg4[%c0_9, %c0_10] : memref<8x32xf32, #tpu.memory_space<vmem>>, vector<1x32xf32>
    %9 = vector.broadcast %8 : vector<1x32xf32> to vector<16x32xf32>
    %10 = arith.addf %7, %9 : vector<16x32xf32>
    %cst_11 = arith.constant 0.000000e+00 : f32
    %11 = vector.broadcast %cst_11 : f32 to vector<16x32xf32>
    %12 = arith.maximumf %10, %11 : vector<16x32xf32>
    %c16 = arith.constant 16 : index
    %c0_12 = arith.constant 0 : index
    %13 = vector.load %arg3[%c16, %c0_12] : memref<160x32xf32, #tpu.memory_space<vmem>>, vector<32x32xf32>
    %cst_13 = arith.constant dense<0.000000e+00> : vector<16x32xf32>
    %14 = tpu.matmul %12, %13, %cst_13 {dimension_numbers = #tpu.dot_dimension_numbers<[1], [0], [0], [1], [0, 0, 1, 1], [], []>} : vector<16x32xf32>, vector<32x32xf32>, vector<16x32xf32> -> vector<16x32xf32>
    %c1 = arith.constant 1 : index
    %c0_14 = arith.constant 0 : index
    %15 = vector.load %arg4[%c1, %c0_14] : memref<8x32xf32, #tpu.memory_space<vmem>>, vector<1x32xf32>
    %16 = vector.broadcast %15 : vector<1x32xf32> to vector<16x32xf32>
    %17 = arith.addf %14, %16 : vector<16x32xf32>
    %cst_15 = arith.constant 0.000000e+00 : f32
    %18 = vector.broadcast %cst_15 : f32 to vector<16x32xf32>
    %19 = arith.maximumf %17, %18 : vector<16x32xf32>
    %c48 = arith.constant 48 : index
    %c0_16 = arith.constant 0 : index
    %20 = vector.load %arg3[%c48, %c0_16] : memref<160x32xf32, #tpu.memory_space<vmem>>, vector<32x32xf32>
    %cst_17 = arith.constant dense<0.000000e+00> : vector<16x32xf32>
    %21 = tpu.matmul %19, %20, %cst_17 {dimension_numbers = #tpu.dot_dimension_numbers<[1], [0], [0], [1], [0, 0, 1, 1], [], []>} : vector<16x32xf32>, vector<32x32xf32>, vector<16x32xf32> -> vector<16x32xf32>
    %c2 = arith.constant 2 : index
    %c0_18 = arith.constant 0 : index
    %22 = vector.load %arg4[%c2, %c0_18] : memref<8x32xf32, #tpu.memory_space<vmem>>, vector<1x32xf32>
    %23 = vector.broadcast %22 : vector<1x32xf32> to vector<16x32xf32>
    %24 = arith.addf %21, %23 : vector<16x32xf32>
    %cst_19 = arith.constant 0.000000e+00 : f32
    %25 = vector.broadcast %cst_19 : f32 to vector<16x32xf32>
    %26 = arith.maximumf %24, %25 : vector<16x32xf32>
    %c80 = arith.constant 80 : index
    %c0_20 = arith.constant 0 : index
    %27 = vector.load %arg3[%c80, %c0_20] : memref<160x32xf32, #tpu.memory_space<vmem>>, vector<4x32xf32>
    %cst_21 = arith.constant dense<0.000000e+00> : vector<20x32xf32>
    %28 = tpu.matmul %2, %27, %cst_21 {dimension_numbers = #tpu.dot_dimension_numbers<[1], [0], [0], [1], [0, 0, 1, 1], [], []>} : vector<20x4xf32>, vector<4x32xf32>, vector<20x32xf32> -> vector<20x32xf32>
    %c3 = arith.constant 3 : index
    %c0_22 = arith.constant 0 : index
    %29 = vector.load %arg4[%c3, %c0_22] : memref<8x32xf32, #tpu.memory_space<vmem>>, vector<1x32xf32>
    %30 = vector.broadcast %29 : vector<1x32xf32> to vector<20x32xf32>
    %31 = arith.addf %28, %30 : vector<20x32xf32>
    %c88 = arith.constant 88 : index
    %c0_23 = arith.constant 0 : index
    %32 = vector.load %arg3[%c88, %c0_23] : memref<160x32xf32, #tpu.memory_space<vmem>>, vector<4x32xf32>
    %cst_24 = arith.constant dense<0.000000e+00> : vector<16x32xf32>
    %33 = tpu.matmul %0, %32, %cst_24 {dimension_numbers = #tpu.dot_dimension_numbers<[1], [0], [0], [1], [0, 0, 1, 1], [], []>} : vector<16x4xf32>, vector<4x32xf32>, vector<16x32xf32> -> vector<16x32xf32>
    %c4 = arith.constant 4 : index
    %c0_25 = arith.constant 0 : index
    %34 = vector.load %arg4[%c4, %c0_25] : memref<8x32xf32, #tpu.memory_space<vmem>>, vector<1x32xf32>
    %35 = vector.broadcast %34 : vector<1x32xf32> to vector<16x32xf32>
    %36 = arith.addf %33, %35 : vector<16x32xf32>
    %c96 = arith.constant 96 : index
    %c0_26 = arith.constant 0 : index
    %37 = vector.load %arg3[%c96, %c0_26] : memref<160x32xf32, #tpu.memory_space<vmem>>, vector<32x32xf32>
    %cst_27 = arith.constant dense<0.000000e+00> : vector<16x32xf32>
    %38 = tpu.matmul %26, %37, %cst_27 {dimension_numbers = #tpu.dot_dimension_numbers<[1], [0], [0], [1], [0, 0, 1, 1], [], []>} : vector<16x32xf32>, vector<32x32xf32>, vector<16x32xf32> -> vector<16x32xf32>
    %c5 = arith.constant 5 : index
    %c0_28 = arith.constant 0 : index
    %39 = vector.load %arg4[%c5, %c0_28] : memref<8x32xf32, #tpu.memory_space<vmem>>, vector<1x32xf32>
    %40 = vector.broadcast %39 : vector<1x32xf32> to vector<16x32xf32>
    %41 = arith.addf %38, %40 : vector<16x32xf32>
    %c0_29 = arith.constant 0 : index
    %c0_30 = arith.constant 0 : index
    %42 = vector.load %arg5[%c0_29, %c0_30] : memref<20x16xf32, #tpu.memory_space<vmem>>, vector<20x16xf32>
    %43 = tpu.iota {dimensions = array<i32: 1>} : vector<1x32xi32>
    %cst_31 = arith.constant 0.000000e+00 : f32
    %44 = vector.broadcast %cst_31 : f32 to vector<20x32xf32>
    %c0_i32 = arith.constant 0 : i32
    %45 = vector.broadcast %c0_i32 : i32 to vector<1x32xi32>
    %46 = arith.cmpi sge, %43, %45 : vector<1x32xi32>
    %c8_i32 = arith.constant 8 : i32
    %47 = vector.broadcast %c8_i32 : i32 to vector<1x32xi32>
    %48 = arith.cmpi slt, %43, %47 : vector<1x32xi32>
    %49 = arith.andi %46, %48 : vector<1x32xi1>
    %cst_32 = arith.constant 0.000000e+00 : f32
    %50 = vector.shape_cast %49 : vector<1x32xi1> to vector<1x32xi1>
    %51 = vector.broadcast %50 : vector<1x32xi1> to vector<20x32xi1>
    %52 = vector.broadcast %cst_32 : f32 to vector<20x32xf32>
    %53 = arith.select %51, %31, %52 : vector<20x32xi1>, vector<20x32xf32>
    %cst_33 = arith.constant dense<0.000000e+00> : vector<20x16xf32>
    %54 = tpu.matmul %53, %36, %cst_33 {dimension_numbers = #tpu.dot_dimension_numbers<[1], [1], [0], [0], [0, 0, 1, 0], [], []>} : vector<20x32xf32>, vector<16x32xf32>, vector<20x16xf32> -> vector<20x16xf32>
    %55 = arith.addf %54, %42 : vector<20x16xf32>
    %cst_34 = arith.constant dense<0xFF800000> : vector<20xf32>
    %56 = vector.multi_reduction <maximumf>, %55, %cst_34 [1] : vector<20x16xf32> to vector<20xf32>
    %57 = vector.shape_cast %56 : vector<20xf32> to vector<20x1xf32>
    %58 = vector.broadcast %57 : vector<20x1xf32> to vector<20x16xf32>
    %59 = arith.subf %55, %58 : vector<20x16xf32>
    %60 = math.exp %59 : vector<20x16xf32>
    %cst_35 = arith.constant dense<0.000000e+00> : vector<20xf32>
    %61 = vector.multi_reduction <add>, %60, %cst_35 [1] : vector<20x16xf32> to vector<20xf32>
    %62 = vector.shape_cast %61 : vector<20xf32> to vector<20x1xf32>
    %63 = tpu.reciprocal %62 : vector<20x1xf32> -> vector<20x1xf32>
    %64 = vector.broadcast %63 : vector<20x1xf32> to vector<20x16xf32>
    %65 = arith.mulf %60, %64 : vector<20x16xf32>
    %cst_36 = arith.constant 0.000000e+00 : f32
    %66 = vector.shape_cast %49 : vector<1x32xi1> to vector<1x32xi1>
    %67 = vector.broadcast %66 : vector<1x32xi1> to vector<16x32xi1>
    %68 = vector.broadcast %cst_36 : f32 to vector<16x32xf32>
    %69 = arith.select %67, %41, %68 : vector<16x32xi1>, vector<16x32xf32>
    %cst_37 = arith.constant dense<0.000000e+00> : vector<20x32xf32>
    %70 = tpu.matmul %65, %69, %cst_37 {dimension_numbers = #tpu.dot_dimension_numbers<[1], [0], [0], [1], [0, 0, 1, 1], [], []>} : vector<20x16xf32>, vector<16x32xf32>, vector<20x32xf32> -> vector<20x32xf32>
    %71 = arith.addf %44, %70 : vector<20x32xf32>
    %c8_i32_38 = arith.constant 8 : i32
    %72 = vector.broadcast %c8_i32_38 : i32 to vector<1x32xi32>
    %73 = arith.cmpi sge, %43, %72 : vector<1x32xi32>
    %c16_i32 = arith.constant 16 : i32
    %74 = vector.broadcast %c16_i32 : i32 to vector<1x32xi32>
    %75 = arith.cmpi slt, %43, %74 : vector<1x32xi32>
    %76 = arith.andi %73, %75 : vector<1x32xi1>
    %cst_39 = arith.constant 0.000000e+00 : f32
    %77 = vector.shape_cast %76 : vector<1x32xi1> to vector<1x32xi1>
    %78 = vector.broadcast %77 : vector<1x32xi1> to vector<20x32xi1>
    %79 = vector.broadcast %cst_39 : f32 to vector<20x32xf32>
    %80 = arith.select %78, %31, %79 : vector<20x32xi1>, vector<20x32xf32>
    %cst_40 = arith.constant dense<0.000000e+00> : vector<20x16xf32>
    %81 = tpu.matmul %80, %36, %cst_40 {dimension_numbers = #tpu.dot_dimension_numbers<[1], [1], [0], [0], [0, 0, 1, 0], [], []>} : vector<20x32xf32>, vector<16x32xf32>, vector<20x16xf32> -> vector<20x16xf32>
    %82 = arith.addf %81, %42 : vector<20x16xf32>
    %cst_41 = arith.constant dense<0xFF800000> : vector<20xf32>
    %83 = vector.multi_reduction <maximumf>, %82, %cst_41 [1] : vector<20x16xf32> to vector<20xf32>
    %84 = vector.shape_cast %83 : vector<20xf32> to vector<20x1xf32>
    %85 = vector.broadcast %84 : vector<20x1xf32> to vector<20x16xf32>
    %86 = arith.subf %82, %85 : vector<20x16xf32>
    %87 = math.exp %86 : vector<20x16xf32>
    %cst_42 = arith.constant dense<0.000000e+00> : vector<20xf32>
    %88 = vector.multi_reduction <add>, %87, %cst_42 [1] : vector<20x16xf32> to vector<20xf32>
    %89 = vector.shape_cast %88 : vector<20xf32> to vector<20x1xf32>
    %90 = tpu.reciprocal %89 : vector<20x1xf32> -> vector<20x1xf32>
    %91 = vector.broadcast %90 : vector<20x1xf32> to vector<20x16xf32>
    %92 = arith.mulf %87, %91 : vector<20x16xf32>
    %cst_43 = arith.constant 0.000000e+00 : f32
    %93 = vector.shape_cast %76 : vector<1x32xi1> to vector<1x32xi1>
    %94 = vector.broadcast %93 : vector<1x32xi1> to vector<16x32xi1>
    %95 = vector.broadcast %cst_43 : f32 to vector<16x32xf32>
    %96 = arith.select %94, %41, %95 : vector<16x32xi1>, vector<16x32xf32>
    %cst_44 = arith.constant dense<0.000000e+00> : vector<20x32xf32>
    %97 = tpu.matmul %92, %96, %cst_44 {dimension_numbers = #tpu.dot_dimension_numbers<[1], [0], [0], [1], [0, 0, 1, 1], [], []>} : vector<20x16xf32>, vector<16x32xf32>, vector<20x32xf32> -> vector<20x32xf32>
    %98 = arith.addf %71, %97 : vector<20x32xf32>
    %c16_i32_45 = arith.constant 16 : i32
    %99 = vector.broadcast %c16_i32_45 : i32 to vector<1x32xi32>
    %100 = arith.cmpi sge, %43, %99 : vector<1x32xi32>
    %c24_i32 = arith.constant 24 : i32
    %101 = vector.broadcast %c24_i32 : i32 to vector<1x32xi32>
    %102 = arith.cmpi slt, %43, %101 : vector<1x32xi32>
    %103 = arith.andi %100, %102 : vector<1x32xi1>
    %cst_46 = arith.constant 0.000000e+00 : f32
    %104 = vector.shape_cast %103 : vector<1x32xi1> to vector<1x32xi1>
    %105 = vector.broadcast %104 : vector<1x32xi1> to vector<20x32xi1>
    %106 = vector.broadcast %cst_46 : f32 to vector<20x32xf32>
    %107 = arith.select %105, %31, %106 : vector<20x32xi1>, vector<20x32xf32>
    %cst_47 = arith.constant dense<0.000000e+00> : vector<20x16xf32>
    %108 = tpu.matmul %107, %36, %cst_47 {dimension_numbers = #tpu.dot_dimension_numbers<[1], [1], [0], [0], [0, 0, 1, 0], [], []>} : vector<20x32xf32>, vector<16x32xf32>, vector<20x16xf32> -> vector<20x16xf32>
    %109 = arith.addf %108, %42 : vector<20x16xf32>
    %cst_48 = arith.constant dense<0xFF800000> : vector<20xf32>
    %110 = vector.multi_reduction <maximumf>, %109, %cst_48 [1] : vector<20x16xf32> to vector<20xf32>
    %111 = vector.shape_cast %110 : vector<20xf32> to vector<20x1xf32>
    %112 = vector.broadcast %111 : vector<20x1xf32> to vector<20x16xf32>
    %113 = arith.subf %109, %112 : vector<20x16xf32>
    %114 = math.exp %113 : vector<20x16xf32>
    %cst_49 = arith.constant dense<0.000000e+00> : vector<20xf32>
    %115 = vector.multi_reduction <add>, %114, %cst_49 [1] : vector<20x16xf32> to vector<20xf32>
    %116 = vector.shape_cast %115 : vector<20xf32> to vector<20x1xf32>
    %117 = tpu.reciprocal %116 : vector<20x1xf32> -> vector<20x1xf32>
    %118 = vector.broadcast %117 : vector<20x1xf32> to vector<20x16xf32>
    %119 = arith.mulf %114, %118 : vector<20x16xf32>
    %cst_50 = arith.constant 0.000000e+00 : f32
    %120 = vector.shape_cast %103 : vector<1x32xi1> to vector<1x32xi1>
    %121 = vector.broadcast %120 : vector<1x32xi1> to vector<16x32xi1>
    %122 = vector.broadcast %cst_50 : f32 to vector<16x32xf32>
    %123 = arith.select %121, %41, %122 : vector<16x32xi1>, vector<16x32xf32>
    %cst_51 = arith.constant dense<0.000000e+00> : vector<20x32xf32>
    %124 = tpu.matmul %119, %123, %cst_51 {dimension_numbers = #tpu.dot_dimension_numbers<[1], [0], [0], [1], [0, 0, 1, 1], [], []>} : vector<20x16xf32>, vector<16x32xf32>, vector<20x32xf32> -> vector<20x32xf32>
    %125 = arith.addf %98, %124 : vector<20x32xf32>
    %c24_i32_52 = arith.constant 24 : i32
    %126 = vector.broadcast %c24_i32_52 : i32 to vector<1x32xi32>
    %127 = arith.cmpi sge, %43, %126 : vector<1x32xi32>
    %c32_i32 = arith.constant 32 : i32
    %128 = vector.broadcast %c32_i32 : i32 to vector<1x32xi32>
    %129 = arith.cmpi slt, %43, %128 : vector<1x32xi32>
    %130 = arith.andi %127, %129 : vector<1x32xi1>
    %cst_53 = arith.constant 0.000000e+00 : f32
    %131 = vector.shape_cast %130 : vector<1x32xi1> to vector<1x32xi1>
    %132 = vector.broadcast %131 : vector<1x32xi1> to vector<20x32xi1>
    %133 = vector.broadcast %cst_53 : f32 to vector<20x32xf32>
    %134 = arith.select %132, %31, %133 : vector<20x32xi1>, vector<20x32xf32>
    %cst_54 = arith.constant dense<0.000000e+00> : vector<20x16xf32>
    %135 = tpu.matmul %134, %36, %cst_54 {dimension_numbers = #tpu.dot_dimension_numbers<[1], [1], [0], [0], [0, 0, 1, 0], [], []>} : vector<20x32xf32>, vector<16x32xf32>, vector<20x16xf32> -> vector<20x16xf32>
    %136 = arith.addf %135, %42 : vector<20x16xf32>
    %cst_55 = arith.constant dense<0xFF800000> : vector<20xf32>
    %137 = vector.multi_reduction <maximumf>, %136, %cst_55 [1] : vector<20x16xf32> to vector<20xf32>
    %138 = vector.shape_cast %137 : vector<20xf32> to vector<20x1xf32>
    %139 = vector.broadcast %138 : vector<20x1xf32> to vector<20x16xf32>
    %140 = arith.subf %136, %139 : vector<20x16xf32>
    %141 = math.exp %140 : vector<20x16xf32>
    %cst_56 = arith.constant dense<0.000000e+00> : vector<20xf32>
    %142 = vector.multi_reduction <add>, %141, %cst_56 [1] : vector<20x16xf32> to vector<20xf32>
    %143 = vector.shape_cast %142 : vector<20xf32> to vector<20x1xf32>
    %144 = tpu.reciprocal %143 : vector<20x1xf32> -> vector<20x1xf32>
    %145 = vector.broadcast %144 : vector<20x1xf32> to vector<20x16xf32>
    %146 = arith.mulf %141, %145 : vector<20x16xf32>
    %cst_57 = arith.constant 0.000000e+00 : f32
    %147 = vector.shape_cast %130 : vector<1x32xi1> to vector<1x32xi1>
    %148 = vector.broadcast %147 : vector<1x32xi1> to vector<16x32xi1>
    %149 = vector.broadcast %cst_57 : f32 to vector<16x32xf32>
    %150 = arith.select %148, %41, %149 : vector<16x32xi1>, vector<16x32xf32>
    %cst_58 = arith.constant dense<0.000000e+00> : vector<20x32xf32>
    %151 = tpu.matmul %146, %150, %cst_58 {dimension_numbers = #tpu.dot_dimension_numbers<[1], [0], [0], [1], [0, 0, 1, 1], [], []>} : vector<20x16xf32>, vector<16x32xf32>, vector<20x32xf32> -> vector<20x32xf32>
    %152 = arith.addf %125, %151 : vector<20x32xf32>
    %c128 = arith.constant 128 : index
    %c0_59 = arith.constant 0 : index
    %153 = vector.load %arg3[%c128, %c0_59] : memref<160x32xf32, #tpu.memory_space<vmem>>, vector<32x32xf32>
    %cst_60 = arith.constant dense<0.000000e+00> : vector<20x32xf32>
    %154 = tpu.matmul %152, %153, %cst_60 {dimension_numbers = #tpu.dot_dimension_numbers<[1], [0], [0], [1], [0, 0, 1, 1], [], []>} : vector<20x32xf32>, vector<32x32xf32>, vector<20x32xf32> -> vector<20x32xf32>
    %c6 = arith.constant 6 : index
    %c0_61 = arith.constant 0 : index
    %155 = vector.load %arg4[%c6, %c0_61] : memref<8x32xf32, #tpu.memory_space<vmem>>, vector<1x32xf32>
    %156 = vector.broadcast %155 : vector<1x32xf32> to vector<20x32xf32>
    %157 = arith.addf %154, %156 : vector<20x32xf32>
    %c0_62 = arith.constant 0 : index
    %c0_63 = arith.constant 0 : index
    %158 = vector.load %arg6[%c0_62, %c0_63] : memref<20x32xf32, #tpu.memory_space<vmem>>, vector<20x32xf32>
    tpu.vector_store %arg6[%c0_62, %c0_63], %157 {strides = array<i32>} : memref<20x32xf32, #tpu.memory_space<vmem>>, vector<20x32xf32>,
    return
  }
}

</mosaic_0001>

<bundles_post_ra>
// kernel: tpu_custom_call.1
= control target key start
LH: loop header
LB: loop body
LE: loop exit
PB: predicated region body
PF: predicated region fallthrough
CT: control target
= control target key end

     0   :  { %vm40_vm0 = vcmask 1041408   ;;  %vm126_vm1 = vcmask 1043456   ;;  %vm33_vm2 = vcmask 15360   ;;  %vm119_vm3 = vcmask 31744   ;;  %s2638_s0 = inlined_call_operand.vmem [shape: f32[16,4], index: 0, kind: input, shape index: {}]   ;;  %s2639_s1 = inlined_call_operand.vmem [shape: f32[16,2], index: 1, kind: input, shape index: {}]   ;;  %s2640_s2 = inlined_call_operand.vmem [shape: f32[20,4], index: 2, kind: input, shape index: {}]   ;;  %s2641_s3 = inlined_call_operand.vmem [shape: f32[160,32], index: 3, kind: input, shape index: {}]   ;;  %s2642_s4 = inlined_call_operand.vmem [shape: f32[8,32], index: 4, kind: input, shape index: {}]   ;;  %s2643_s5 = inlined_call_operand.vmem [shape: f32[20,16], index: 5, kind: input, shape index: {}]   ;;  %s2644_s6 = inlined_call_operand.hbm [shape: f32[20,32], index: 6, kind: output, shape index: {}]  }
   0x1   :  { %v32_v0 = vld [vmem:[%s2641_s3 + $0x8] sm:$0x3]  ;;  %v31_v1 = vld [vmem:[%s2641_s3] sm:$0xf] }
   0x2   :  { %1839 = vmatprep.subr.msk.mxu1 %vm40_vm0, %v32_v0  ;;  %1844 = vmatprep.subr.msk.mxu0 %vm126_vm1, %v31_v1  ;;  %v26_v2 = vld [vmem:[%s2639_s1] sm:$0xff]  ;;  %v27_v4 = vld [vmem:[%s2639_s1 + $0x8] sm:$0xff] }
   0x3   :  { %v2233_v3 = vld [vmem:[%s2638_s0] sm:$0xff]  ;;  %1840 = vmatpush3.msk.msra.mxu1 %vm40_vm0, %v32_v0  ;;  %1841 = vmatprep.mubr.msk.f32.mxu1 %vm33_vm2, %v26_v2  ;;  %v2241_v5 = vld [vmem:[%s2638_s0 + $0x8] sm:$0xff] }
   0x4   :  { %11 = vsyncpa [#allocation3], 0  ;;  %1845 = vmatpush3.msk.msra.mxu0 %vm126_vm1, %v31_v1  ;;  %1846 = vmatprep.mubr.msk.f32.mxu0 %vm119_vm3, %v2233_v3  ;;  %v214_v6 = vld [vmem:[%s2641_s3 + $0x10] sm:$0xff]  ;;  %v215_v7 = vld [vmem:[%s2641_s3 + $0x18] sm:$0xff]  ;;  %vm223_vm4 = vcmask 261120   ;;  %v2179_v32 = vmov 0.0   ;;  %v674_v57 = vlaneseq }
   0x5   :  { %1842 = vmatmul.mubr.msk.f32.vlgmr.msra.gmra.mrb[0].mxu1 %vm33_vm2, %v27_v4  ;;  %1847 = vmatmul.mubr.msk.f32.vlgmr.msra.gmra.mrb[0].mxu0 %vm119_vm3, %v2241_v5  ;;  %v2019_v8 = vpack.c.bf16 %v215_v7, %v214_v6  ;;  %v216_v9 = vld [vmem:[%s2641_s3 + $0x20] sm:$0xff]  ;;  %v217_v10 = vld [vmem:[%s2641_s3 + $0x28] sm:$0xff]  ;;  %v307_v12 = vld [vmem:[%s2641_s3 + $0x30] sm:$0xff]  ;;  %vm2180_vm5 = vmmov 0   ;;  %v2181_v48 = vmov 0.0|0.0   ;;  %vm779_vm2 = vcmask 130048  }
   0x6   :  { %v2023_v11 = vpack.c.bf16 %v217_v10, %v216_v9  ;;  %v308_v13 = vld [vmem:[%s2641_s3 + $0x38] sm:$0xff]  ;;  %v1698_v17 = vld [vmem:[%s2642_s4] ss:$0 sm:$0xff]  ;;  %v310_v27 = vld [vmem:[%s2641_s3 + $0x48] sm:$0xff]  ;;  %v2336_v0 = vand.u32 127, %v674_v57  ;;  %s2182_s14 = smov [#allocation2]  }
   0x7   :  { %2020 = vmatprep.subr.bf16.mxu1 %v2019_v8  ;;  %v2027_v14 = vpack.c.bf16 %v308_v13, %v307_v12  ;;  %v309_v26 = vld [vmem:[%s2641_s3 + $0x40] sm:$0xff]  ;;  %v497_v29 = vld [vmem:[%s2641_s3 + $0x58] sm:$0xf]  ;;  %v399_v30 = vld [vmem:[%s2641_s3 + $0x50] sm:$0xf] }
   0x8   :  { %2022 = vmatpush3.bf16.msra.mxu1 %v2019_v8  ;;  %v2031_v28 = vpack.c.bf16 %v310_v27, %v309_v26  ;;  %v28_v31 = vld [vmem:[%s2640_s2] sm:$0xff]  ;;  %v582_v34 = vld [vmem:[%s2641_s3 + $0x68] sm:$0xff]  ;;  %v30_v37 = vld [vmem:[%s2640_s2 + $0x10] sm:$0xf]  ;;  %vm816_vm7 = vcmp.ge.s32.totalorder %v2336_v0, 8  ;;  %vm817_vm8 = vcmp.lt.s32.totalorder %v2336_v0, 16 }
   0x9   :  { %2024 = vmatprep.subr.bf16.mxu1 %v2023_v11  ;;  %2028 = vmatprep.subr.bf16.mxu0 %v2027_v14  ;;  %v581_v33 = vld [vmem:[%s2641_s3 + $0x60] sm:$0xff]  ;;  %v29_v36 = vld [vmem:[%s2640_s2 + $0x8] sm:$0xff]  ;;  %v583_v45 = vld [vmem:[%s2641_s3 + $0x70] sm:$0xff]  ;;  %vm677_vm9 = vcmp.lt.s32.totalorder %v2336_v0, 8  ;;  %vm1126_vm11 = vcmp.ge.s32.totalorder %v2336_v0, 16  ;;  %vm1127_vm12 = vcmp.lt.s32.totalorder %v2336_v0, 24 }
   0xa   :  { %2030 = vmatpush3.bf16.msra.mxu0 %v2027_v14  ;;  %v2035_v35 = vpack.c.bf16 %v582_v34, %v581_v33  ;;  %v1699_v38 = vld [vmem:[%s2642_s4 + $0x1] ss:$0 sm:$0xff]  ;;  %v584_v46 = vld [vmem:[%s2641_s3 + $0x78] sm:$0xff]  ;;  %v1702_v55 = vld [vmem:[%s2642_s4 + $0x2] ss:$0 sm:$0xff]  ;;  %vm1350_vm14 = vcmp.ge.s32.totalorder %v2336_v0, 24 }
   0xb   :  { %2032 = vmatprep.subr.bf16.mxu0 %v2031_v28  ;;  %v2039_v47 = vpack.c.bf16 %v584_v46, %v583_v45  ;;  %v1710_v61 = vld [vmem:[%s2642_s4 + $0x4] ss:$0 sm:$0xff]  ;;  %vm2342_vm6 = vmpackc.low %vm223_vm4, %vm223_vm4  ;;  %v1705_v6 = vld [vmem:[%s2642_s4 + $0x3] ss:$0 sm:$0xff]  ;;  %vm1351_vm15 = vcmp.lt.s32.totalorder %v2336_v0, 32  ;;  %s1681_s2 = sshll.u32 %s2182_s14, 4  ;;  %s1682_s2 = int_to_ptr.vmem [resolvable:$true] %s1681_s2 }
   0xc   :  { %2026 = vmatpush3.bf16.msra.mxu1 %v2023_v11  ;;  %vm2358_vm10 = vmand %vm816_vm7, %vm817_vm8  ;;  %v1714_v26 = vld [vmem:[%s2642_s4 + $0x5] ss:$0 sm:$0xff]  ;;  %v673_v46 = vld [vmem:[%s2643_s5 + $0x10] sm:$0xf]  ;;  %s2155_s15 = scalar_lea.vmem %s1682_s2, 384  ;;  %p2160_p1 = scmp.lt.s32.totalorder %s1682_s2, %s1682_s2 }
   0xd   :  { %1871 = vmatprep.subr.mxu1 %v2179_v32  ;;  %vm2395_vm13 = vmand %vm1126_vm11, %vm1127_vm12  ;;  %v671_v33 = vld [vmem:[%s2643_s5] sm:$0xff]  ;;  %p2156_p0 = scmp.ne.s32.totalorder %s1682_s2, %s2155_s15  ;;  %p2161_p2 = scmp.lt.s32.totalorder %s2155_s15, %s2155_s15 }
   0xe   :  { %2034 = vmatpush3.bf16.msra.mxu0 %v2031_v28  ;;  %vm2421_vm0 = vmand %vm1350_vm14, %vm1351_vm15 }
   0xf   :  { %1882 = vmatprep.subr.msk.mxu0 %vm126_vm1, %v497_v29  ;;  %vm2065_vm7 = vmpackc.low %vm2395_vm13, %vm2395_vm13  ;;  %p2162_p3 = por %p2161_p2, %p2160_p1 }
  0x10   :  { %vm2073_vm8 = vmpackc.low %vm2421_vm0, %vm2421_vm0 }
  0x11   :  { %p2163_p4 = pnand %p2162_p3, %p2156_p0 }
  0xd8   :  { %v1843_v15 = vpop.f32.mrb[0].mxu1  ;;  %v1848_v16 = vpop.f32.mrb[0].mxu0 }
  0xd9   :  { %v202_v18 = vadd.f32 %v1848_v16, %v1843_v15  ;;  %v110_v19 = vpop.f32.mrb[1].mxu1  ;;  %v196_v20 = vpop.f32.mrb[1].mxu0 }
  0xda   :  { %v197_v21 = vadd.f32 %v196_v20, %v110_v19 }
  0xdb   :  { %v211_v22 = vadd.f32 %v1698_v17, %v202_v18 }
  0xdc   :  { %v210_v23 = vadd.f32 %v1698_v17, %v197_v21 }
  0xdd   :  { %v213_v25 = vmax.f32 %v211_v22, 0.0 }
  0xde   :  { %v212_v24 = vmax.f32 %v210_v23, 0.0 }
  0xe0   :  { %1857 = vmatprep.mubr.msk.f32.mxu1 %vm223_vm4, %v212_v24 }
  0xe1   :  { %1858 = vmatmul.mubr.msk.f32.vlgmr.msra.gmra.mrb[2].mxu1 %vm223_vm4, %v213_v25 }
  0xe2   :  { %1873 = vmatprep.mubr.msk.f32.mxu1 %vm2180_vm5, %v2179_v32  ;;  %1872 = vmatpush3.msk.msra.mxu1 %vm126_vm1, %v399_v30 }
  0xe3   :  { %2036 = vmatprep.subr.bf16.mxu1 %v2035_v35 }
  0xe5   :  { %1874 = vmatmul.mubr.msk.f32.vlgmr.msra.gmra.mrb[4].mxu1 %vm119_vm3, %v28_v31 }
  0xe6   :  { %1876 = vmatprep.mubr.msk.f32.mxu1 %vm2180_vm5, %v2179_v32  ;;  %2038 = vmatpush3.bf16.msra.mxu1 %v2035_v35 }
  0xe7   :  { %2040 = vmatprep.subr.bf16.mxu1 %v2039_v47 }
  0xe9   :  { %1877 = vmatmul.mubr.msk.f32.gmra.mrb[6].mxu1 %vm119_vm3, %v29_v36 }
  0xea   :  { %1879 = vmatprep.mubr.msk.f32.mxu1 %vm2180_vm5, %v2179_v32  ;;  %2042 = vmatpush3.bf16.msra.mxu1 %v2039_v47 }
  0xeb   :  { %2047 = vmatprep.subr.bf16.mxu1 %v2181_v48 }
  0xed   :  { %1880 = vmatmul.mubr.msk.f32.gmra.mrb[8].mxu1 %vm119_vm3, %v30_v37 }
 0x1b4   :  { %v1859_v39 = vpop.f32.mrb[2].mxu1 }
 0x1b5   :  { %v302_v40 = vadd.f32 %v1859_v39, %v1699_v38  ;;  %v296_v41 = vpop.f32.mrb[3].mxu1  ;;  %v672_v39 = vld [vmem:[%s2643_s5 + $0x8] sm:$0xff] }
 0x1b6   :  { %v297_v42 = vadd.f32 %v1699_v38, %v296_v41 }
 0x1b7   :  { %v306_v44 = vmax.f32 %v302_v40, 0.0 }
 0x1b8   :  { %v305_v43 = vmax.f32 %v297_v42, 0.0  ;;  %v483_v49 = vpop.f32.mrb[4].mxu1 }
 0x1b9   :  { %v1875_v50 = vpop.f32.mrb[5].mxu1  ;;  %v484_v8 = vadd.f32 %v1705_v6, %v483_v49 }
 0x1ba   :  { %1868 = vmatprep.mubr.msk.f32.mxu0 %vm223_vm4, %v305_v43 }
 0x1bb   :  { %1869 = vmatmul.mubr.msk.f32.vlgmr.msra.gmra.mrb[2].mxu0 %vm223_vm4, %v306_v44  ;;  %v681_v11 = vsel %vm677_vm9, %v484_v8, 0.0  ;;  %v821_v12 = vsel %vm2358_vm10, %v484_v8, 0.0  ;;  %v1131_v19 = vsel %vm2395_vm13, %v484_v8, 0.0  ;;  %v1355_v23 = vsel %vm2421_vm0, %v484_v8, 0.0 }
 0x1bc   :  { %1883 = vmatpush3.msk.msra.mxu0 %vm126_vm1, %v497_v29  ;;  %1884 = vmatprep.mubr.msk.f32.mxu0 %vm119_vm3, %v2233_v3  ;;  %v488_v51 = vpop.f32.mrb[6].mxu1  ;;  %vm2053_vm1 = vmpackc.low %vm2358_vm10, %vm2358_vm10 }
 0x1bd   :  { %2043 = vmatprep.subr.bf16.mxu0 %v2181_v48  ;;  %v1878_v52 = vpop.f32.mrb[7].mxu1  ;;  %v489_v10 = vadd.f32 %v1705_v6, %v488_v51 }
 0x1bf   :  { %1885 = vmatmul.mubr.msk.f32.vlgmr.msra.gmra.mrb[4].mxu0 %vm119_vm3, %v2241_v5  ;;  %v682_v14 = vsel %vm677_vm9, %v489_v10, 0.0  ;;  %v822_v15 = vsel %vm2358_vm10, %v489_v10, 0.0  ;;  %v1132_v20 = vsel %vm2395_vm13, %v489_v10, 0.0  ;;  %v1356_v24 = vsel %vm2421_vm0, %v489_v10, 0.0 }
 0x1c0   :  { %1902 = vmatprep.mubr.msk.f32.mxu0 %vm2180_vm5, %v2179_v32  ;;  %v493_v53 = vpop.f32.mrb[8].mxu1  ;;  %vm786_vm3 = vcmask 125952  }
 0x1c1   :  { %v1881_v54 = vpop.f32.mrb[9].mxu1  ;;  %v494_v13 = vadd.f32 %v1705_v6, %v493_v53 }
 0x1c3   :  { %v683_v16 = vsel %vm677_vm9, %v494_v13, 0.0  ;;  %v823_v17 = vsel %vm2358_vm10, %v494_v13, 0.0  ;;  %v1133_v21 = vsel %vm2395_vm13, %v494_v13, 0.0  ;;  %v1357_v25 = vsel %vm2421_vm0, %v494_v13, 0.0 }
 0x28e   :  { %v1870_v56 = vpop.f32.mrb[2].mxu0 }
 0x28f   :  { %v394_v58 = vadd.f32 %v1870_v56, %v1702_v55  ;;  %v388_v59 = vpop.f32.mrb[3].mxu0 }
 0x290   :  { %v389_v60 = vadd.f32 %v1702_v55, %v388_v59 }
 0x291   :  { %v398_v1 = vmax.f32 %v394_v58, 0.0 }
 0x292   :  { %v397_v62 = vmax.f32 %v389_v60, 0.0  ;;  %v1886_v63 = vpop.f32.mrb[4].mxu0 }
 0x293   :  { %v578_v2 = vadd.f32 %v1886_v63, %v1710_v61  ;;  %v572_v3 = vpop.f32.mrb[5].mxu0 }
 0x294   :  { %v573_v4 = vadd.f32 %v1710_v61, %v572_v3  ;;  %1895 = vmatprep.mubr.msk.f32.mxu1 %vm223_vm4, %v397_v62 }
 0x295   :  { %1896 = vmatmul.mubr.msk.f32.vlgmr.msra.gmra.mrb[10].mxu1 %vm223_vm4, %v398_v1 }
 0x296   :  { %v2044_v7 = vpack.c.bf16 %v578_v2, %v573_v4  ;;  %1915 = vmatprep.mubr.msk.f32.mxu1 %vm2180_vm5, %v2179_v32 }
 0x298   :  { %2046 = vmatpush3.bf16.xpose.msk.msra.mxu0 %vm2342_vm6, %v2044_v7  ;;  %2050 = vmatpush3.bf16.xpose.msk.msra.mxu1 %vm2342_vm6, %v2044_v7 }
 0x299   :  { %2059 = vmatprep.subr.bf16.mxu1 %v2181_v48  ;;  %2051 = vmatprep.subr.bf16.mxu0 %v2181_v48 }
 0x29f   :  { %1903 = vmatmul.mubr.msk.f32.vlgmr.msra.gmra.mrb[6].mxu0 %vm223_vm4, %v681_v11  ;;  %1916 = vmatmul.mubr.msk.f32.vlgmr.msra.gmra.mrb[12].mxu1 %vm223_vm4, %v821_v12 }
 0x2a0   :  { %2062 = vmatpush3.bf16.xpose.msk.msra.mxu1 %vm2342_vm6, %v2044_v7  ;;  %1905 = vmatprep.mubr.msk.f32.mxu0 %vm2180_vm5, %v2179_v32 }
 0x2a1   :  { %1918 = vmatprep.mubr.msk.f32.mxu1 %vm2180_vm5, %v2179_v32  ;;  %2067 = vmatprep.subr.bf16.mxu1 %v2181_v48 }
 0x2a3   :  { %1906 = vmatmul.mubr.msk.f32.gmra.mrb[8].mxu0 %vm223_vm4, %v682_v14  ;;  %1919 = vmatmul.mubr.msk.f32.gmra.mrb[14].mxu1 %vm223_vm4, %v822_v15 }
 0x2a4   :  { %1908 = vmatprep.mubr.msk.f32.mxu0 %vm2180_vm5, %v2179_v32  ;;  %1921 = vmatprep.mubr.msk.f32.mxu1 %vm2180_vm5, %v2179_v32 }
 0x2a7   :  { %1909 = vmatmul.mubr.msk.f32.gmra.mrb[10].mxu0 %vm223_vm4, %v683_v16  ;;  %1922 = vmatmul.mubr.msk.f32.gmra.mrb[16].mxu1 %vm223_vm4, %v823_v17 }
 0x2a8   :  { %1954 = vmatprep.mubr.msk.f32.mxu1 %vm2180_vm5, %v2179_v32  ;;  %1928 = vmatprep.mubr.msk.f32.mxu0 %vm2180_vm5, %v2179_v32 }
 0x2ab   :  { %1955 = vmatmul.mubr.msk.f32.vlgmr.msra.gmra.mrb[18].mxu1 %vm223_vm4, %v1131_v19 }
 0x2ac   :  { %2070 = vmatpush3.bf16.xpose.msk.msra.mxu1 %vm2342_vm6, %v2044_v7  ;;  %1957 = vmatprep.mubr.msk.f32.mxu1 %vm2180_vm5, %v2179_v32  ;;  %vm2057_vm6 = vmpackc.low %vm677_vm9, %vm677_vm9 }
 0x2ad   :  { %2075 = vmatprep.subr.bf16.mxu1 %v2181_v48 }
 0x2af   :  { %1958 = vmatmul.mubr.msk.f32.gmra.mrb[20].mxu1 %vm223_vm4, %v1132_v20 }
 0x2b0   :  { %1960 = vmatprep.mubr.msk.f32.mxu1 %vm2180_vm5, %v2179_v32 }
 0x2b3   :  { %1961 = vmatmul.mubr.msk.f32.gmra.mrb[22].mxu1 %vm223_vm4, %v1133_v21 }
 0x2b4   :  { %1980 = vmatprep.mubr.msk.f32.mxu1 %vm2180_vm5, %v2179_v32 }
 0x2b7   :  { %1981 = vmatmul.mubr.msk.f32.vlgmr.msra.gmra.mrb[24].mxu1 %vm223_vm4, %v1355_v23 }
 0x2b8   :  { %1983 = vmatprep.mubr.msk.f32.mxu1 %vm2180_vm5, %v2179_v32 }
 0x2bb   :  { %1984 = vmatmul.mubr.msk.f32.gmra.mrb[26].mxu1 %vm223_vm4, %v1356_v24 }
 0x2bc   :  { %1986 = vmatprep.mubr.msk.f32.mxu1 %vm2180_vm5, %v2179_v32 }
 0x2bf   :  { %1987 = vmatmul.mubr.msk.f32.gmra.mrb[28].mxu1 %vm223_vm4, %v1357_v25 }
 0x2c0   :  { %2010 = vmatprep.mubr.msk.f32.mxu1 %vm2180_vm5, %v2179_v32 }
 0x368   :  { %v1897_v27 = vpop.f32.mrb[10].mxu1 }
 0x369   :  { %v668_v28 = vadd.f32 %v1897_v27, %v1714_v26  ;;  %v662_v29 = vpop.f32.mrb[11].mxu1 }
 0x36a   :  { %v663_v30 = vadd.f32 %v1714_v26, %v662_v29 }
 0x36c   :  { %v2448_v31 = vpack.c.bf16 %v668_v28, %v663_v30 }
 0x36e   :  { %2054 = vmatpush3.bf16.msk.msra.mxu0 %vm2053_vm1, %v2448_v31 }
 0x36f   :  { %2055 = vmatprep.subr.bf16.mxu0 %v2181_v48 }
 0x372   :  { %v765_v34 = vpop.f32.mrb[6].mxu0  ;;  %v899_v35 = vpop.f32.mrb[12].mxu1 }
 0x373   :  { %v2455_v36 = vadd.f32 %v899_v35, %v671_v33  ;;  %v1904_v37 = vpop.f32.mrb[7].mxu0  ;;  %v1917_v38 = vpop.f32.mrb[13].mxu1  ;;  %v766_v55 = vadd.f32 %v765_v34, %v671_v33 }
 0x375   :  { %v913_v40 = vsel %vm779_vm2, %v2455_v36, -inf  ;;  %v780_v62 = vsel %vm779_vm2, %v766_v55, -inf }
 0x376   :  { %v770_v41 = vpop.f32.mrb[8].mxu0  ;;  %914 = vmax.xlane.f32.xlu0 %v913_v40  ;;  %v904_v42 = vpop.f32.mrb[14].mxu1 }
 0x377   :  { %v905_v43 = vadd.f32 %v904_v42, %v672_v39  ;;  %v1907_v44 = vpop.f32.mrb[9].mxu0  ;;  %v1920_v45 = vpop.f32.mrb[15].mxu1  ;;  %v771_v47 = vadd.f32 %v770_v41, %v672_v39 }
 0x379   :  { %v916_v49 = vsel %vm779_vm2, %v905_v43, -inf  ;;  %v783_v56 = vsel %vm779_vm2, %v771_v47, -inf }
 0x37a   :  { %v775_v50 = vpop.f32.mrb[10].mxu0  ;;  %917 = vmax.xlane.f32.xlu0 %v916_v49  ;;  %v909_v51 = vpop.f32.mrb[16].mxu1 }
 0x37b   :  { %v910_v52 = vadd.f32 %v909_v51, %v673_v46  ;;  %v1910_v53 = vpop.f32.mrb[11].mxu0  ;;  %v1923_v54 = vpop.f32.mrb[17].mxu1  ;;  %v776_v61 = vadd.f32 %v775_v50, %v673_v46 }
 0x37d   :  { %v919_v57 = vsel %vm786_vm3, %v910_v52, -inf  ;;  %v787_v4 = vsel %vm786_vm3, %v776_v61, -inf }
 0x37e   :  { %784 = vmax.xlane.f32.xlu0 %v783_v56  ;;  %920 = vmax.xlane.f32.xlu1 %v919_v57  ;;  %v1209_v58 = vpop.f32.mrb[18].mxu1 }
 0x37f   :  { %v1210_v59 = vadd.f32 %v1209_v58, %v671_v33  ;;  %v1956_v60 = vpop.f32.mrb[19].mxu1 }
 0x381   :  { %v1223_v63 = vsel %vm779_vm2, %v1210_v59, -inf }
 0x382   :  { %781 = vmax.xlane.f32.xlu1 %v780_v62  ;;  %1224 = vmax.xlane.f32.xlu0 %v1223_v63  ;;  %v1214_v1 = vpop.f32.mrb[20].mxu1 }
 0x383   :  { %v1959_v2 = vpop.f32.mrb[21].mxu1  ;;  %v2470_v3 = vadd.f32 %v1214_v1, %v672_v39 }
 0x385   :  { %v1226_v8 = vsel %vm779_vm2, %v2470_v3, -inf }
 0x386   :  { %788 = vmax.xlane.f32.xlu1 %v787_v4  ;;  %v1219_v5 = vpop.f32.mrb[22].mxu1 }
 0x387   :  { %v1220_v6 = vadd.f32 %v1219_v5, %v673_v46  ;;  %v1962_v7 = vpop.f32.mrb[23].mxu1 }
 0x389   :  { %v1229_v9 = vsel %vm786_vm3, %v1220_v6, -inf }
 0x38a   :  { %1227 = vmax.xlane.f32.xlu1 %v1226_v8  ;;  %1230 = vmax.xlane.f32.xlu0 %v1229_v9  ;;  %v1433_v10 = vpop.f32.mrb[24].mxu1 }
 0x38b   :  { %v2476_v11 = vadd.f32 %v1433_v10, %v671_v33  ;;  %v1982_v12 = vpop.f32.mrb[25].mxu1 }
 0x38d   :  { %v1447_v13 = vsel %vm779_vm2, %v2476_v11, -inf }
 0x38e   :  { %1448 = vmax.xlane.f32.xlu1 %v1447_v13  ;;  %v1438_v14 = vpop.f32.mrb[26].mxu1 }
 0x38f   :  { %v2480_v15 = vadd.f32 %v1438_v14, %v672_v39  ;;  %v1985_v16 = vpop.f32.mrb[27].mxu1 }
 0x391   :  { %v1450_v17 = vsel %vm779_vm2, %v2480_v15, -inf }
 0x392   :  { %1451 = vmax.xlane.f32.xlu0 %v1450_v17  ;;  %v1443_v19 = vpop.f32.mrb[28].mxu1 }
 0x393   :  { %v2484_v20 = vadd.f32 %v1443_v19, %v673_v46  ;;  %v1988_v21 = vpop.f32.mrb[29].mxu1 }
 0x395   :  { %v1453_v23 = vsel %vm786_vm3, %v2484_v20, -inf }
 0x396   :  { %1454 = vmax.xlane.f32.xlu1 %v1453_v23 }
 0x403   :  { %v915_v24 = vpop.xlane.xlu0 %914 }
 0x404   :  { %v922_v25 = vsub.f32 %v2455_v36, %v915_v24 }
 0x406   :  { %v925_v26 = vmul.f32 1.442695, %v922_v25 }
 0x407   :  { %v918_v27 = vpop.xlane.xlu0 %917 }
 0x408   :  { %2107 = vpow2.f32 %v925_v26  ;;  %v923_v28 = vsub.f32 %v905_v43, %v918_v27  ;;  %v1574_v26 = vld [vmem:[%s2641_s3 + $0x80] sm:$0xff]  ;;  %v1575_v27 = vld [vmem:[%s2641_s3 + $0x88] sm:$0xff] }
 0x40a   :  { %v927_v29 = vmul.f32 1.442695, %v923_v28  ;;  %v1576_v28 = vld [vmem:[%s2641_s3 + $0x90] sm:$0xff] }
 0x40b   :  { %v785_v30 = vpop.xlane.xlu0 %784  ;;  %v921_v33 = vpop.xlane.xlu1 %920 }
 0x40c   :  { %2109 = vpow2.f32 %v927_v29  ;;  %v791_v34 = vsub.f32 %v771_v47, %v785_v30  ;;  %v924_v35 = vsub.f32 %v910_v52, %v921_v33  ;;  %v2076_v29 = vpack.c.bf16 %v1575_v27, %v1574_v26  ;;  %v1577_v30 = vld [vmem:[%s2641_s3 + $0x98] sm:$0xff] }
 0x40d   :  { %v2079_v33 = vpack.c.bf16 %v1577_v30, %v1576_v28 }
 0x40e   :  { %v929_v37 = vmul.f32 1.442695, %v924_v35  ;;  %v795_v38 = vmul.f32 1.442695, %v791_v34  ;;  %2077 = vmatpush3.bf16.msra.mxu1 %v2076_v29 }
 0x40f   :  { %v782_v39 = vpop.xlane.xlu1 %781  ;;  %v1225_v40 = vpop.xlane.xlu0 %1224  ;;  %2078 = vmatprep.subr.bf16.mxu1 %v2181_v48 }
 0x410   :  { %v790_v41 = vsub.f32 %v766_v55, %v782_v39  ;;  %v1232_v42 = vsub.f32 %v1210_v59, %v1225_v40  ;;  %2111 = vpow2.f32 %v929_v37 }
 0x411   :  { %2113 = vpow2.f32 %v795_v38 }
 0x412   :  { %v2489_v44 = vpop.eup %2107  ;;  %v793_v36 = vmul.f32 1.442695, %v790_v41  ;;  %v1235_v45 = vmul.f32 1.442695, %v1232_v42  ;;  %2080 = vmatpush3.bf16.msra.mxu1 %v2079_v33 }
 0x413   :  { %v789_v46 = vpop.xlane.xlu1 %788  ;;  %v931_v43 = vsel %vm779_vm2, %v2489_v44, 0.0 }
 0x414   :  { %2115 = vpow2.f32 %v793_v36  ;;  %v792_v49 = vsub.f32 %v776_v61, %v789_v46  ;;  %932 = vadd.xlane.f32.xlu0 %v931_v43 }
 0x415   :  { %2117 = vpow2.f32 %v1235_v45 }
 0x416   :  { %v2493_v47 = vpop.eup %2109  ;;  %v797_v50 = vmul.f32 1.442695, %v792_v49 }
 0x417   :  { %v1228_v51 = vpop.xlane.xlu1 %1227  ;;  %v1231_v52 = vpop.xlane.xlu0 %1230  ;;  %v934_v53 = vsel %vm779_vm2, %v2493_v47, 0.0 }
 0x418   :  { %2119 = vpow2.f32 %v797_v50  ;;  %v1233_v54 = vsub.f32 %v2470_v3, %v1228_v51  ;;  %v1234_v55 = vsub.f32 %v1220_v6, %v1231_v52  ;;  %935 = vadd.xlane.f32.xlu1 %v934_v53 }
 0x41a   :  { %v1237_v56 = vmul.f32 1.442695, %v1233_v54  ;;  %v1239_v57 = vmul.f32 1.442695, %v1234_v55  ;;  %v2498_v58 = vpop.eup %2111 }
 0x41b   :  { %v1449_v59 = vpop.xlane.xlu1 %1448  ;;  %v937_v61 = vsel %vm786_vm3, %v2498_v58, 0.0  ;;  %v2503_v62 = vpop.eup %2113 }
 0x41c   :  { %2121 = vpow2.f32 %v1237_v56  ;;  %v1456_v60 = vsub.f32 %v2476_v11, %v1449_v59  ;;  %938 = vadd.xlane.f32.xlu0 %v937_v61  ;;  %v802_v5 = vsel %vm779_vm2, %v2503_v62, 0.0 }
 0x41d   :  { %2123 = vpow2.f32 %v1239_v57 }
 0x41e   :  { %v2505_v63 = vpop.eup %2115  ;;  %v1459_v1 = vmul.f32 1.442695, %v1456_v60 }
 0x41f   :  { %v1452_v2 = vpop.xlane.xlu0 %1451  ;;  %v799_v3 = vsel %vm779_vm2, %v2505_v63, 0.0  ;;  %v2512_v6 = vpop.eup %2117 }
 0x420   :  { %2125 = vpow2.f32 %v1459_v1  ;;  %v1457_v4 = vsub.f32 %v2480_v15, %v1452_v2  ;;  %800 = vadd.xlane.f32.xlu1 %v799_v3  ;;  %803 = vadd.xlane.f32.xlu0 %v802_v5  ;;  %v1241_v12 = vsel %vm779_vm2, %v2512_v6, 0.0 }
 0x422   :  { %v2514_v7 = vpop.eup %2119  ;;  %v1461_v8 = vmul.f32 1.442695, %v1457_v4 }
 0x423   :  { %v1455_v9 = vpop.xlane.xlu1 %1454  ;;  %v805_v10 = vsel %vm786_vm3, %v2514_v7, 0.0 }
 0x424   :  { %2127 = vpow2.f32 %v1461_v8  ;;  %v1458_v11 = vsub.f32 %v2484_v20, %v1455_v9  ;;  %806 = vadd.xlane.f32.xlu1 %v805_v10  ;;  %1242 = vadd.xlane.f32.xlu0 %v1241_v12  ;;  %v1757_v9 = vld [vmem:[%s2642_s4 + $0x6] ss:$0 sm:$0xff] }
 0x426   :  { %v2521_v13 = vpop.eup %2121  ;;  %v1463_v14 = vmul.f32 1.442695, %v1458_v11 }
 0x427   :  { %v2523_v15 = vpop.eup %2123  ;;  %v1244_v16 = vsel %vm779_vm2, %v2521_v13, 0.0 }
 0x428   :  { %2129 = vpow2.f32 %v1463_v14  ;;  %v1247_v17 = vsel %vm786_vm3, %v2523_v15, 0.0  ;;  %1245 = vadd.xlane.f32.xlu1 %v1244_v16 }
 0x429   :  { %1248 = vadd.xlane.f32.xlu0 %v1247_v17 }
 0x42a   :  { %v2529_v19 = vpop.eup %2125 }
 0x42b   :  { %v1465_v20 = vsel %vm779_vm2, %v2529_v19, 0.0 }
 0x42c   :  { %1466 = vadd.xlane.f32.xlu1 %v1465_v20 }
 0x42e   :  { %v2533_v21 = vpop.eup %2127 }
 0x42f   :  { %v1468_v23 = vsel %vm779_vm2, %v2533_v21, 0.0 }
 0x430   :  { %1469 = vadd.xlane.f32.xlu0 %v1468_v23 }
 0x432   :  { %v2537_v24 = vpop.eup %2129 }
 0x433   :  { %v1471_v25 = vsel %vm786_vm3, %v2537_v24, 0.0 }
 0x434   :  { %1472 = vadd.xlane.f32.xlu1 %v1471_v25 }
 0x4a1   :  { %v933_v34 = vpop.xlane.xlu0 %932 }
 0x4a2   :  { %2131 = vrcp.f32 %v933_v34 }
 0x4a5   :  { %v936_v35 = vpop.xlane.xlu1 %935 }
 0x4a6   :  { %2133 = vrcp.f32 %v936_v35 }
 0x4a9   :  { %v939_v37 = vpop.xlane.xlu0 %938 }
 0x4aa   :  { %2135 = vrcp.f32 %v939_v37 }
 0x4ac   :  { %v2132_v38 = vpop.eup %2131 }
 0x4ad   :  { %v943_v39 = vmul.f32 %v2132_v38, %v2489_v44  ;;  %v801_v40 = vpop.xlane.xlu1 %800  ;;  %v804_v41 = vpop.xlane.xlu0 %803 }
 0x4ae   :  { %2137 = vrcp.f32 %v801_v40 }
 0x4af   :  { %1929 = vmatmul.mubr.msk.f32.vlgmr.msra.gmra.mrb[12].mxu0 %vm779_vm2, %v943_v39  ;;  %2139 = vrcp.f32 %v804_v41 }
 0x4b0   :  { %v2134_v42 = vpop.eup %2133  ;;  %2058 = vmatpush3.bf16.msk.msra.mxu0 %vm2057_vm6, %v2448_v31  ;;  %1931 = vmatprep.mubr.msk.f32.mxu0 %vm2180_vm5, %v2179_v32 }
 0x4b1   :  { %v944_v36 = vmul.f32 %v2134_v42, %v2493_v47  ;;  %2063 = vmatprep.subr.bf16.mxu0 %v2181_v48  ;;  %v807_v44 = vpop.xlane.xlu1 %806  ;;  %v1243_v45 = vpop.xlane.xlu0 %1242 }
 0x4b2   :  { %2141 = vrcp.f32 %v807_v44 }
 0x4b3   :  { %1932 = vmatmul.mubr.msk.f32.gmra.mrb[14].mxu0 %vm779_vm2, %v944_v36  ;;  %2143 = vrcp.f32 %v1243_v45 }
 0x4b4   :  { %1934 = vmatprep.mubr.msk.f32.mxu0 %vm2180_vm5, %v2179_v32  ;;  %v2136_v0 = vpop.eup %2135 }
 0x4b5   :  { %v945_v46 = vmul.f32 %v2136_v0, %v2498_v58  ;;  %v1246_v47 = vpop.xlane.xlu1 %1245 }
 0x4b6   :  { %2145 = vrcp.f32 %v1246_v47  ;;  %v1249_v51 = vpop.xlane.xlu0 %1248 }
 0x4b7   :  { %1935 = vmatmul.mubr.msk.f32.gmra.mrb[16].mxu0 %vm779_vm2, %v945_v46  ;;  %2147 = vrcp.f32 %v1249_v51 }
 0x4b8   :  { %v2138_v43 = vpop.eup %2137  ;;  %1941 = vmatprep.mubr.msk.f32.mxu0 %vm2180_vm5, %v2179_v32 }
 0x4b9   :  { %v811_v49 = vmul.f32 %v2138_v43, %v2505_v63  ;;  %v2140_v50 = vpop.eup %2139  ;;  %v1467_v18 = vpop.xlane.xlu1 %1466 }
 0x4ba   :  { %v812_v52 = vmul.f32 %v2140_v50, %v2503_v62  ;;  %2149 = vrcp.f32 %v1467_v18 }
 0x4bb   :  { %1942 = vmatmul.mubr.msk.f32.vlgmr.msra.gmra.mrb[12].mxu0 %vm779_vm2, %v811_v49 }
 0x4bc   :  { %2066 = vmatpush3.bf16.msk.msra.mxu0 %vm2065_vm7, %v2448_v31  ;;  %1944 = vmatprep.mubr.msk.f32.mxu0 %vm2180_vm5, %v2179_v32  ;;  %v2142_v53 = vpop.eup %2141 }
 0x4bd   :  { %2071 = vmatprep.subr.bf16.mxu0 %v2181_v48  ;;  %v813_v54 = vmul.f32 %v2142_v53, %v2514_v7  ;;  %v2144_v55 = vpop.eup %2143  ;;  %v1470_v48 = vpop.xlane.xlu0 %1469 }
 0x4be   :  { %v1253_v56 = vmul.f32 %v2144_v55, %v2512_v6  ;;  %2151 = vrcp.f32 %v1470_v48 }
 0x4bf   :  { %1945 = vmatmul.mubr.msk.f32.gmra.mrb[14].mxu0 %vm779_vm2, %v812_v52 }
 0x4c0   :  { %1947 = vmatprep.mubr.msk.f32.mxu0 %vm2180_vm5, %v2179_v32  ;;  %v2146_v57 = vpop.eup %2145 }
 0x4c1   :  { %v1473_v58 = vpop.xlane.xlu1 %1472  ;;  %v1254_v59 = vmul.f32 %v2146_v57, %v2521_v13  ;;  %v2148_v60 = vpop.eup %2147 }
 0x4c2   :  { %2153 = vrcp.f32 %v1473_v58  ;;  %v1255_v22 = vmul.f32 %v2148_v60, %v2523_v15 }
 0x4c3   :  { %1948 = vmatmul.mubr.msk.f32.gmra.mrb[16].mxu0 %vm779_vm2, %v813_v54 }
 0x4c4   :  { %1967 = vmatprep.mubr.msk.f32.mxu0 %vm2180_vm5, %v2179_v32  ;;  %v2150_v61 = vpop.eup %2149 }
 0x4c7   :  { %1968 = vmatmul.mubr.msk.f32.vlgmr.msra.gmra.mrb[12].mxu0 %vm779_vm2, %v1253_v56 }
 0x4c8   :  { %2074 = vmatpush3.bf16.msk.msra.mxu0 %vm2073_vm8, %v2448_v31  ;;  %1970 = vmatprep.mubr.msk.f32.mxu0 %vm2180_vm5, %v2179_v32  ;;  %v1477_v31 = vmul.f32 %v2150_v61, %v2529_v19  ;;  %v2152_v62 = vpop.eup %2151 }
 0x4c9   :  { %v1478_v63 = vmul.f32 %v2152_v62, %v2533_v21 }
 0x4cb   :  { %1971 = vmatmul.mubr.msk.f32.gmra.mrb[14].mxu0 %vm779_vm2, %v1254_v59 }
 0x4cc   :  { %1973 = vmatprep.mubr.msk.f32.mxu0 %vm2180_vm5, %v2179_v32  ;;  %v2154_v1 = vpop.eup %2153 }
 0x4cd   :  { %v1479_v2 = vmul.f32 %v2154_v1, %v2537_v24 }
 0x4cf   :  { %1974 = vmatmul.mubr.msk.f32.gmra.mrb[16].mxu0 %vm779_vm2, %v1255_v22 }
 0x4d0   :  { %1993 = vmatprep.mubr.msk.f32.mxu0 %vm2180_vm5, %v2179_v32 }
 0x4d3   :  { %1994 = vmatmul.mubr.msk.f32.vlgmr.msra.gmra.mrb[12].mxu0 %vm779_vm2, %v1477_v31 }
 0x4d4   :  { %1996 = vmatprep.mubr.msk.f32.mxu0 %vm2180_vm5, %v2179_v32 }
 0x4d7   :  { %1997 = vmatmul.mubr.msk.f32.gmra.mrb[14].mxu0 %vm779_vm2, %v1478_v63 }
 0x4d8   :  { %1999 = vmatprep.mubr.msk.f32.mxu0 %vm2180_vm5, %v2179_v32 }
 0x4db   :  { %2000 = vmatmul.mubr.msk.f32.gmra.mrb[16].mxu0 %vm779_vm2, %v1479_v2 }
 0x5a6   :  { %v1557_v3 = vpop.f32.mrb[12].mxu0 }
 0x5a7   :  { %v1995_v4 = vpop.f32.mrb[13].mxu0  ;;  %2011 = vmatmul.mubr.msk.f32.vlgmr.msra.gmra.mrb[30].mxu1 %vm223_vm4, %v1557_v3 }
 0x5a8   :  { %2013 = vmatprep.mubr.msk.f32.mxu1 %vm2180_vm5, %v2179_v32 }
 0x5aa   :  { %v1562_v5 = vpop.f32.mrb[14].mxu0 }
 0x5ab   :  { %v1998_v6 = vpop.f32.mrb[15].mxu0  ;;  %2014 = vmatmul.mubr.msk.f32.gmra.mrb[32].mxu1 %vm223_vm4, %v1562_v5 }
 0x5ac   :  { %2016 = vmatprep.mubr.msk.f32.mxu1 %vm2180_vm5, %v2179_v32  ;;  %vm1674_vm5 = vcmask 257024  }
 0x5ae   :  { %v1567_v7 = vpop.f32.mrb[16].mxu0 }
 0x5af   :  { %v2001_v8 = vpop.f32.mrb[17].mxu0  ;;  %2017 = vmatmul.mubr.msk.f32.gmra.mrb[34].mxu1 %vm223_vm4, %v1567_v7 }
 0x67a   :  { %v1658_v10 = vpop.f32.mrb[30].mxu1 }
 0x67b   :  { %v1659_v11 = vadd.f32 %v1757_v9, %v1658_v10  ;;  %v2012_v12 = vpop.f32.mrb[31].mxu1 }
 0x67d   :  { %1672 = vst.msk [vmem:[#allocation2] sm:$0xff] %vm223_vm4, %v1659_v11 }
 0x67e   :  { %v1663_v13 = vpop.f32.mrb[32].mxu1 }
 0x67f   :  { %v1664_v14 = vadd.f32 %v1757_v9, %v1663_v13  ;;  %v2015_v15 = vpop.f32.mrb[33].mxu1 }
 0x681   :  { %1673 = vst.msk [vmem:[#allocation2 + $0x8] sm:$0xff] %vm223_vm4, %v1664_v14 }
 0x682   :  { %v1668_v32 = vpop.f32.mrb[34].mxu1 }
 0x683   :  { %v1669_v16 = vadd.f32 %v1757_v9, %v1668_v32  ;;  %v2018_v17 = vpop.f32.mrb[35].mxu1 }
 0x685   :  { %1675 = vst.msk [vmem:[#allocation2 + $0x10] sm:$0xf] %vm1674_vm5, %v1669_v16 }
 0x686   :  { %2166 = shalt.err (!%p2163_p4)
}
 0x687   :  { %s2167_s17 = scalar_lea.hbm %s2644_s6, 384 }
 0x688   :  { %p2168_p5 = scmp.ne.s32.totalorder %s2644_s6, %s2167_s17  ;;  %p2171_p6 = scmp.lt.u32.totalorder %s2167_s17, %s2644_s6 }
 0x68a   :  { %p2173_p7 = pnand %p2171_p6, %p2168_p5 }
 0x68c   :  { %2176 = shalt.err (!%p2173_p7)
}
 0x68d   :  { %s2183_s22 = smov 128   ;;  %s2184_s23 = smov 8  }
 0x68e   :  { %1687 = dma.vmem_to_hbm [thread:$0]  %s1682_s2, 384, %s2644_s6, [#allocation3], %s2183_s22, %s2183_s22, %s2184_s23  }
 0x68f   :  { %2177 = dma.done.wait [#allocation3], 384  }
 0x690   :  { %2178 = vsyncadd [#allocation3], 4294966912 }
 0x691   :  { %1691 = vsyncpa [#allocation3], 1 }

</bundles_post_ra>
